<compile_context>
chip_gen: v6e
topology: v6e:2x2x1
jax: 0.10.0
libtpu: 0.0.40
codegen_flags: <defaults>
</compile_context>

<pallas_src>
import jax
import jax.numpy as jnp
from jax.experimental import pallas as pl
from jax.experimental.pallas import tpu as pltpu


def _normalize_kernel(sb_ref, x_ref, o_ref):
    # sb_ref: (R, 2) f32 per-row constants -- col 0 = 1/std, col 1 = -mean/std
    # x_ref / o_ref: (R, T) tiles, T a multiple of 128 (lane-dense)
    scale = sb_ref[:, 0:1]
    bias = sb_ref[:, 1:2]
    xf = x_ref[...].astype(jnp.float32)
    o_ref[...] = (xf * scale + bias).astype(o_ref.dtype)


def _round_up(a, b):
    return ((a + b - 1) // b) * b


def normalize(x, mean, std):
    """(x - mean[None,:,None,None]) / std[None,:,None,None] for NCHW x."""
    N, C, H, W = x.shape
    NC, HW = N * C, H * W

    # Precompute f32 scale/bias once on C elements (never per-pixel) and pack
    # them into one (NC, 2) array so there is a single constant DMA stream.
    inv_std = 1.0 / std.astype(jnp.float32)
    bias = -mean.astype(jnp.float32) * inv_std
    sb = jnp.stack([jnp.tile(inv_std, N), jnp.tile(bias, N)], axis=-1)  # (NC, 2)

    x2 = x.reshape(NC, HW)
    itemsize = jnp.dtype(x.dtype).itemsize

    # Lane-dense column tile: multiple of 128, wide enough for contiguous HBM
    # bursts, capped so one row of the tile stays reasonable.
    block_cols = min(_round_up(HW, 128), 8192)

    # Row tile: ~8 MiB per in/out buffer (sized from the actual dtype), so
    # double-buffered in+out is ~32 MiB; add the tiny padded constant blocks
    # and we stay well under the 48 MiB VMEM limit set below.
    per_buf_budget = 8 * 1024 * 1024
    block_rows = max(8, (per_buf_budget // (block_cols * itemsize)) // 8 * 8)
    block_rows = min(block_rows, _round_up(NC, 8))
    # Keep >= 2 row-grid steps when the shape allows it so both v7x
    # TensorCores get work (no-op on v5e/v6e which have 1 TC).
    if NC > 8:
        block_rows = min(block_rows, max(8, _round_up(pl.cdiv(NC, 2), 8)))

    grid = (pl.cdiv(NC, block_rows), pl.cdiv(HW, block_cols))

    out = pl.pallas_call(
        _normalize_kernel,
        out_shape=jax.ShapeDtypeStruct((NC, HW), x.dtype),
        grid=grid,
        in_specs=[
            pl.BlockSpec((block_rows, 2), lambda r, s: (r, 0)),           # scale/bias
            pl.BlockSpec((block_rows, block_cols), lambda r, s: (r, s)),  # x
        ],
        out_specs=pl.BlockSpec((block_rows, block_cols), lambda r, s: (r, s)),
        compiler_params=pltpu.CompilerParams(
            dimension_semantics=("parallel", "parallel"),
            vmem_limit_bytes=48 * 1024 * 1024,
        ),
    )(sb, x2)

    return out.reshape(N, C, H, W)


if __name__ == "__main__":
    key = jax.random.PRNGKey(0)
    (kx,) = jax.random.split(key, 1)

    N, C, H, W = 2, 4, 16, 16
    x = jax.random.normal(kx, (N, C, H, W), dtype=jnp.float32)

    # Deterministic per-channel normalization constants (module __init__ args).
    mean = jnp.array([0.485, 0.456, 0.406, 0.5], dtype=jnp.float32)
    std = jnp.array([0.229, 0.224, 0.225, 0.25], dtype=jnp.float32)

    out = normalize(x, mean, std)
    out = jax.block_until_ready(out)

    # Reference check against plain JAX broadcasting semantics.
    ref = (x - mean[None, :, None, None]) / std[None, :, None, None]
    assert out.shape == ref.shape and out.dtype == ref.dtype
    assert jnp.allclose(out, ref, atol=1e-5, rtol=1e-5)

    print("KERNEL_OK")
</pallas_src>

<mosaic_0001>
module attributes {stable_mosaic.version = 11 : i64} {
  func.func @_normalize_kernel(%arg0: i32, %arg1: i32, %arg2: memref<8x2xf32, #tpu.memory_space<vmem>>, %arg3: memref<8x256xf32, #tpu.memory_space<vmem>>, %arg4: memref<8x256xf32, #tpu.memory_space<vmem>>) attributes {dimension_semantics = [#tpu.dimension_semantics<parallel>, #tpu.dimension_semantics<parallel>], iteration_bounds = array<i64: 1, 1>, scalar_prefetch = 0 : i64, scratch_operands = 0 : i64, tpu.core_type = #tpu.core_type<tc>, window_params = [{transform_indices = @transform_0, window_bounds = array<i64: 8, 2>}, {transform_indices = @transform_1, window_bounds = array<i64: 8, 256>}, {transform_indices = @transform_2, window_bounds = array<i64: 8, 256>}]} {
    %c0 = arith.constant 0 : index
    %c0_0 = arith.constant 0 : index
    %0 = vector.load %arg2[%c0, %c0_0] : memref<8x2xf32, #tpu.memory_space<vmem>>, vector<8x1xf32>
    %c0_1 = arith.constant 0 : index
    %c1 = arith.constant 1 : index
    %1 = vector.load %arg2[%c0_1, %c1] : memref<8x2xf32, #tpu.memory_space<vmem>>, vector<8x1xf32>
    %c0_2 = arith.constant 0 : index
    %c0_3 = arith.constant 0 : index
    %2 = vector.load %arg3[%c0_2, %c0_3] : memref<8x256xf32, #tpu.memory_space<vmem>>, vector<8x256xf32>
    %3 = vector.broadcast %0 : vector<8x1xf32> to vector<8x256xf32>
    %4 = arith.mulf %2, %3 : vector<8x256xf32>
    %5 = vector.broadcast %1 : vector<8x1xf32> to vector<8x256xf32>
    %6 = arith.addf %4, %5 : vector<8x256xf32>
    %c0_4 = arith.constant 0 : index
    %c0_5 = arith.constant 0 : index
    %7 = vector.load %arg4[%c0_4, %c0_5] : memref<8x256xf32, #tpu.memory_space<vmem>>, vector<8x256xf32>
    tpu.vector_store %arg4[%c0_4, %c0_5], %6 {strides = array<i32>} : memref<8x256xf32, #tpu.memory_space<vmem>>, vector<8x256xf32>,
    return
  }
  func.func @transform_0(%arg0: i32, %arg1: i32) -> (i32, i32) {
    %c0_i32 = arith.constant 0 : i32
    %c0_i32_0 = arith.constant 0 : i32
    return %arg0, %c0_i32 : i32, i32
  }
  func.func @transform_1(%arg0: i32, %arg1: i32) -> (i32, i32) {
    %c0_i32 = arith.constant 0 : i32
    return %arg0, %arg1 : i32, i32
  }
  func.func @transform_2(%arg0: i32, %arg1: i32) -> (i32, i32) {
    %c0_i32 = arith.constant 0 : i32
    return %arg0, %arg1 : i32, i32
  }
}

</mosaic_0001>

<bundles_post_ra>
// kernel: tpu_custom_call.1
= control target key start
LH: loop header
LB: loop body
LE: loop exit
PB: predicated region body
PF: predicated region fallthrough
CT: control target
= control target key end

     0   :  { %7 = vsyncpa [#allocation3], 0  ;;  %s135_s0 = inlined_call_operand.vmem [shape: f32[8,2], index: 0, kind: input, shape index: {}]   ;;  %s136_s1 = inlined_call_operand.hbm [shape: f32[8,256], index: 1, kind: input, shape index: {}]   ;;  %s137_s2 = inlined_call_operand.hbm [shape: f32[8,256], index: 2, kind: output, shape index: {}]  }
   0x1   :  { %8 = vsyncpa [#allocation4], 0  ;;  %s107_s9 = smov [#allocation2]  }
   0x2   :  { %s17_s10 = sshll.u32 %s107_s9, 4  ;;  %s18_s10 = int_to_ptr.vmem [resolvable:$true] %s17_s10 }
   0x3   :  { %s71_s11 = scalar_lea.vmem %s18_s10, 256  ;;  %p76_p1 = scmp.lt.s32.totalorder %s18_s10, %s18_s10 }
   0x4   :  { %p72_p0 = scmp.ne.s32.totalorder %s18_s10, %s71_s11  ;;  %p77_p2 = scmp.lt.s32.totalorder %s71_s11, %s71_s11 }
   0x6   :  { %p78_p3 = por %p77_p2, %p76_p1 }
   0x8   :  { %p79_p4 = pnand %p78_p3, %p72_p0 }
   0xa   :  { %82 = shalt.err (!%p79_p4)
}
   0xb   :  { %20 = dma.hbm_to_vmem [thread:$0]  %s136_s1, 256, %s18_s10, [#allocation3]  }
   0xc   :  { %103 = dma.done.wait [#allocation3], 256  }
   0xd   :  { %104 = vsyncadd [#allocation3], 4294967040  ;;  %v108_v0 = vmov 0   ;;  %v24_v1 = vld [vmem:[%s135_s0] sm:$0xff]  ;;  %v109_v2 = vmov 1   ;;  %v26_v5 = vld [vmem:[#allocation2 + $0x8] sm:$0xff] }
   0xe   :  { %61 = vset.pattern.permute.xlu0 %v108_v0  ;;  %v25_v4 = vld [vmem:[#allocation2] sm:$0xff]  ;;  %s110_s16 = smov [#allocation5]  }
   0xf   :  { %29 = vperm.xlu0 %61, %v24_v1   ;;  %s48_s17 = sshll.u32 %s110_s16, 4  ;;  %s49_s17 = int_to_ptr.vmem [resolvable:$true] %s48_s17 }
  0x10   :  { %s83_s1 = scalar_lea.vmem %s49_s17, 256  ;;  %p88_p6 = scmp.lt.s32.totalorder %s49_s17, %s49_s17 }
  0x11   :  { %p84_p5 = scmp.ne.s32.totalorder %s49_s17, %s83_s1  ;;  %p89_p7 = scmp.lt.s32.totalorder %s83_s1, %s83_s1 }
  0x13   :  { %62 = vset.pattern.permute.xlu0 %v109_v2  ;;  %p90_p8 = por %p89_p7, %p88_p6 }
  0x14   :  { %35 = vperm.xlu0 %62, %v24_v1  }
  0x15   :  { %p91_p9 = pnand %p90_p8, %p84_p5 }
  0x8a   :  { %v30_v3 = vpop.permute.xlu0 %29 }
  0x8b   :  { %v32_v6 = vmul.f32 %v30_v3, %v25_v4  ;;  %v33_v7 = vmul.f32 %v30_v3, %v26_v5 }
  0x8f   :  { %v36_v8 = vpop.permute.xlu0 %35 }
  0x90   :  { %v38_v9 = vadd.f32 %v36_v8, %v32_v6  ;;  %v39_v10 = vadd.f32 %v36_v8, %v33_v7 }
  0x92   :  { %40 = vst [vmem:[#allocation5] sm:$0xff] %v38_v9  ;;  %41 = vst [vmem:[#allocation5 + $0x8] sm:$0xff] %v39_v10 }
  0x93   :  { %94 = shalt.err (!%p91_p9)
}
  0x94   :  { %51 = dma.vmem_to_hbm [thread:$0]  %s49_s17, 256, %s137_s2, [#allocation4]  }
  0x95   :  { %105 = dma.done.wait [#allocation4], 256  }
  0x96   :  { %106 = vsyncadd [#allocation4], 4294967040 }
  0x97   :  { %55 = vsyncpa [#allocation3], 1 }
  0x98   :  { %56 = vsyncpa [#allocation4], 1 }

</bundles_post_ra>
